<compile_context>
chip_gen: v7x
topology: tpu7x:2x2x1
jax: 0.10.0
libtpu: 0.0.40
codegen_flags: <defaults>
</compile_context>

<pallas_src>
import functools
import math

import jax
import jax.numpy as jnp
from jax.experimental import pallas as pl
from jax.experimental.pallas import tpu as pltpu

# ----------------------------- config ---------------------------------------
B = 2          # batch (number of graphs)
N = 16         # nodes per graph
DIN = 8        # in_features
DOUT = 32      # out_features
ALPHA = 0.2    # LeakyReLU negative slope
DROPOUT = 0.5  # dropout prob (inference: no-op)
LANE = 128
NEG_INF = -9.0e15
HIGHEST = jax.lax.Precision.HIGHEST
# TODO(synk): F.dropout on the attention matrix only fires in training mode; this kernel
# implements inference (dropout = identity). A training variant would draw the mask with
# pltpu.prng_seed / pltpu.prng_random_bits.


# ----------------------------- Pallas kernel --------------------------------
def _gat_kernel(x_ref, bias_ref, w_ref, o_ref, *, alpha, dout):
    """Whole-batch GAT forward on flattened (block-diagonal) node rows.

    x_ref   : (M, Din)     all B*N node features
    bias_ref: (M, M)       additive mask: 0 on within-graph edges, -9e15 elsewhere
                           (block-diagonal, so cross-graph pairs are masked too)
    w_ref   : (Din, Dpad)  augmented weight [W | W@a1 | W@a2 | zeros], lane-dense
    o_ref   : (M, Dpad)    ELU(attn @ h_aug); cols >= dout are garbage, sliced in wrapper
    """
    x = x_ref[...]

    # h_aug = x @ [W | W a1 | W a2 | 0...]   (M, Dpad) — single MXU matmul, full f32.
    h = jnp.dot(x, w_ref[...], preferred_element_type=jnp.float32, precision=HIGHEST)

    # Attention logits fall out of the padded columns (no second matmul).
    f1 = h[:, dout:dout + 1]                        # (M, 1)  == h @ a1
    f2 = jnp.transpose(h[:, dout + 1:dout + 2])     # (1, M)  == (h @ a2)^T, tiny XLU op

    # e[i, j] = leakyrelu(f1[i] + f2[j]) + mask
    e = f1 + f2
    e = jnp.where(e > 0, e, alpha * e)
    e = e + bias_ref[...]

    # Row softmax; masked entries underflow to exactly 0. Exact divide (accuracy).
    row_max = jnp.max(e, axis=-1, keepdims=True)
    p = jnp.exp(e - row_max)
    attn = p / jnp.sum(p, axis=-1, keepdims=True)

    # h' = attn @ h_aug ; concat=True => ELU. exp argument clamped at 0 so the
    # unselected branch never overflows.
    hp = jnp.dot(attn, h, preferred_element_type=jnp.float32, precision=HIGHEST)
    o_ref[...] = jnp.where(hp > 0, hp, jnp.exp(jnp.minimum(hp, 0.0)) - 1.0)


# ----------------------------- wrapper ---------------------------------------
@functools.partial(jax.jit, static_argnames=("alpha",))
def gat_forward(x, adj, W, a, *, alpha=ALPHA):
    b, n, din = x.shape
    dout = W.shape[1]
    m = b * n
    dpad = ((dout + 2 + LANE - 1) // LANE) * LANE   # room for the two fused projections

    # ---- wrapper-side layout plumbing (fused under jit) ----------------------
    # Augmented lane-dense weight: [W | W@a1 | W@a2 | zeros].
    a1 = a[:dout, 0]
    a2 = a[dout:, 0]
    w_aug = jnp.zeros((din, dpad), jnp.float32)
    w_aug = w_aug.at[:, :dout].set(W)
    w_aug = w_aug.at[:, dout].set(jnp.dot(W, a1, precision=HIGHEST))
    w_aug = w_aug.at[:, dout + 1].set(jnp.dot(W, a2, precision=HIGHEST))

    # Flatten the batch into rows and build a block-diagonal additive mask so the
    # softmax of each row only sees its own graph.
    x_flat = x.reshape(m, din)
    adj_bd = jnp.einsum("bc,bij->bicj", jnp.eye(b, dtype=adj.dtype), adj).reshape(m, m)
    bias = jnp.where(adj_bd > 0, 0.0, NEG_INF).astype(jnp.float32)
    # Precondition (same as the torch reference relies on in practice): every node has
    # at least one within-graph edge (GAT keeps self-loops), otherwise its softmax would
    # be uniform over B*N instead of N columns.

    cost = pl.CostEstimate(
        flops=2 * m * din * dpad + 2 * m * m * dpad + 6 * m * m,
        transcendentals=m * m + m * dpad,
        bytes_accessed=4 * (m * din + m * m + din * dpad + m * dpad),
    )

    out_pad = pl.pallas_call(
        functools.partial(_gat_kernel, alpha=alpha, dout=dout),
        out_shape=jax.ShapeDtypeStruct((m, dpad), jnp.float32),
        in_specs=[pl.BlockSpec(memory_space=pltpu.MemorySpace.VMEM)] * 3,
        out_specs=pl.BlockSpec(memory_space=pltpu.MemorySpace.VMEM),
        cost_estimate=cost,
    )(x_flat, bias, w_aug)

    return out_pad[:, :dout].reshape(b, n, dout)


# ----------------------------- pure-JAX reference ----------------------------
def gat_reference(x, adj, W, a, *, alpha=ALPHA):
    dout = W.shape[1]
    h = jnp.einsum("bnd,df->bnf", x, W, precision=HIGHEST)
    f1 = jnp.einsum("bnf,f->bn", h, a[:dout, 0], precision=HIGHEST)
    f2 = jnp.einsum("bnf,f->bn", h, a[dout:, 0], precision=HIGHEST)
    e = f1[:, :, None] + f2[:, None, :]
    e = jnp.where(e > 0, e, alpha * e)
    e = jnp.where(adj > 0, e, NEG_INF)
    attn = jax.nn.softmax(e, axis=2)
    hp = jnp.einsum("bij,bjf->bif", attn, h, precision=HIGHEST)
    return jnp.where(hp > 0, hp, jnp.exp(jnp.minimum(hp, 0.0)) - 1.0)


# ----------------------------- parameter init --------------------------------
def xavier_uniform(key, shape, gain):
    fan_in, fan_out = shape[1], shape[0]  # torch 2-D convention
    bound = gain * math.sqrt(6.0 / (fan_in + fan_out))
    return jax.random.uniform(key, shape, jnp.float32, -bound, bound)


if __name__ == "__main__":
    key = jax.random.PRNGKey(0)
    kx, kadj, kw, ka = jax.random.split(key, 4)

    x = jax.random.normal(kx, (B, N, DIN), jnp.float32)
    # random sparse-ish adjacency with self loops
    adj = (jax.random.uniform(kadj, (B, N, N)) > 0.5).astype(jnp.float32)
    adj = jnp.maximum(adj, jnp.eye(N, dtype=jnp.float32)[None])

    W = xavier_uniform(kw, (DIN, DOUT), gain=1.414)
    a = xavier_uniform(ka, (2 * DOUT, 1), gain=1.414)

    out = jax.block_until_ready(gat_forward(x, adj, W, a))
    ref = gat_reference(x, adj, W, a)

    assert out.shape == (B, N, DOUT)
    max_err = jnp.max(jnp.abs(out - ref))
    assert jnp.allclose(out, ref, atol=1e-3, rtol=1e-3), f"max abs err {max_err}"

    print("KERNEL_OK")
</pallas_src>

<mosaic_0001>
module attributes {stable_mosaic.version = 11 : i64} {
  func.func @_gat_kernel(%arg0: memref<32x8xf32, #tpu.memory_space<vmem>>, %arg1: memref<32x32xf32, #tpu.memory_space<vmem>>, %arg2: memref<8x128xf32, #tpu.memory_space<vmem>>, %arg3: memref<32x128xf32, #tpu.memory_space<vmem>>) attributes {dimension_semantics = [], scalar_prefetch = 0 : i64, scratch_operands = 0 : i64, tpu.core_type = #tpu.core_type<tc>} {
    %c0 = arith.constant 0 : index
    %c0_0 = arith.constant 0 : index
    %0 = vector.load %arg0[%c0, %c0_0] : memref<32x8xf32, #tpu.memory_space<vmem>>, vector<32x8xf32>
    %c0_1 = arith.constant 0 : index
    %c0_2 = arith.constant 0 : index
    %1 = vector.load %arg2[%c0_1, %c0_2] : memref<8x128xf32, #tpu.memory_space<vmem>>, vector<8x128xf32>
    %cst = arith.constant dense<0.000000e+00> : vector<32x128xf32>
    %2 = tpu.matmul %0, %1, %cst {dimension_numbers = #tpu.dot_dimension_numbers<[1], [0], [0], [1], [0, 0, 1, 1], [], []>, precision = #tpu.contract_precision<fp32>} : vector<32x8xf32>, vector<8x128xf32>, vector<32x128xf32> -> vector<32x128xf32>
    %3 = vector.extract_strided_slice %2 {offsets = [0, 32], sizes = [32, 1], strides = [1, 1]} : vector<32x128xf32> to vector<32x1xf32>
    %4 = vector.extract_strided_slice %2 {offsets = [0, 33], sizes = [32, 1], strides = [1, 1]} : vector<32x128xf32> to vector<32x1xf32>
    %5 = tpu.transpose %4, [1, 0] : vector<32x1xf32> -> vector<1x32xf32>
    %6 = vector.broadcast %3 : vector<32x1xf32> to vector<32x32xf32>
    %7 = vector.broadcast %5 : vector<1x32xf32> to vector<32x32xf32>
    %8 = arith.addf %6, %7 : vector<32x32xf32>
    %cst_3 = arith.constant 0.000000e+00 : f32
    %9 = vector.broadcast %cst_3 : f32 to vector<32x32xf32>
    %10 = arith.cmpf ogt, %8, %9 : vector<32x32xf32>
    %cst_4 = arith.constant 2.000000e-01 : f32
    %11 = vector.broadcast %cst_4 : f32 to vector<32x32xf32>
    %12 = arith.mulf %11, %8 : vector<32x32xf32>
    %13 = arith.select %10, %8, %12 : vector<32x32xi1>, vector<32x32xf32>
    %c0_5 = arith.constant 0 : index
    %c0_6 = arith.constant 0 : index
    %14 = vector.load %arg1[%c0_5, %c0_6] : memref<32x32xf32, #tpu.memory_space<vmem>>, vector<32x32xf32>
    %15 = arith.addf %13, %14 : vector<32x32xf32>
    %cst_7 = arith.constant dense<0xFF800000> : vector<32xf32>
    %16 = vector.multi_reduction <maximumf>, %15, %cst_7 [1] : vector<32x32xf32> to vector<32xf32>
    %17 = vector.shape_cast %16 : vector<32xf32> to vector<32x1xf32>
    %18 = vector.broadcast %17 : vector<32x1xf32> to vector<32x32xf32>
    %19 = arith.subf %15, %18 : vector<32x32xf32>
    %20 = math.exp %19 : vector<32x32xf32>
    %cst_8 = arith.constant dense<0.000000e+00> : vector<32xf32>
    %21 = vector.multi_reduction <add>, %20, %cst_8 [1] : vector<32x32xf32> to vector<32xf32>
    %22 = vector.shape_cast %21 : vector<32xf32> to vector<32x1xf32>
    %23 = vector.broadcast %22 : vector<32x1xf32> to vector<32x32xf32>
    %24 = arith.divf %20, %23 : vector<32x32xf32>
    %cst_9 = arith.constant dense<0.000000e+00> : vector<32x128xf32>
    %25 = tpu.matmul %24, %2, %cst_9 {dimension_numbers = #tpu.dot_dimension_numbers<[1], [0], [0], [1], [0, 0, 1, 1], [], []>, precision = #tpu.contract_precision<fp32>} : vector<32x32xf32>, vector<32x128xf32>, vector<32x128xf32> -> vector<32x128xf32>
    %cst_10 = arith.constant 0.000000e+00 : f32
    %26 = vector.broadcast %cst_10 : f32 to vector<32x128xf32>
    %27 = arith.cmpf ogt, %25, %26 : vector<32x128xf32>
    %cst_11 = arith.constant 0.000000e+00 : f32
    %28 = vector.broadcast %cst_11 : f32 to vector<32x128xf32>
    %29 = arith.minimumf %25, %28 : vector<32x128xf32>
    %30 = math.exp %29 : vector<32x128xf32>
    %cst_12 = arith.constant 1.000000e+00 : f32
    %31 = vector.broadcast %cst_12 : f32 to vector<32x128xf32>
    %32 = arith.subf %30, %31 : vector<32x128xf32>
    %33 = arith.select %27, %25, %32 : vector<32x128xi1>, vector<32x128xf32>
    %c0_13 = arith.constant 0 : index
    %c0_14 = arith.constant 0 : index
    %34 = vector.load %arg3[%c0_13, %c0_14] : memref<32x128xf32, #tpu.memory_space<vmem>>, vector<32x128xf32>
    tpu.vector_store %arg3[%c0_13, %c0_14], %33 {strides = array<i32>} : memref<32x128xf32, #tpu.memory_space<vmem>>, vector<32x128xf32>,
    return
  }
}

</mosaic_0001>

<bundles_post_ra>
// kernel: gat_forward.1
= control target key start
LH: loop header
LB: loop body
LE: loop exit
PB: predicated region body
PF: predicated region fallthrough
CT: control target
= control target key end

     0   :  { %vm20_vm0 = vcmask 64512   ;;  %s1897_s0 = inlined_call_operand.vmem [shape: f32[32,8], index: 0, kind: input, shape index: {}]   ;;  %s1898_s1 = inlined_call_operand.vmem [shape: f32[32,32], index: 1, kind: input, shape index: {}]   ;;  %s1899_s2 = inlined_call_operand.vmem [shape: f32[8,128], index: 2, kind: input, shape index: {}]   ;;  %s1900_s3 = inlined_call_operand.hbm [shape: f32[32,128], index: 3, kind: output, shape index: {}]  }
   0x1   :  { %v19_v0 = vld [vmem:[%s1899_s2] sm:$0xff]  ;;  %v16_v2 = vld [vmem:[%s1897_s0 + $0x8] sm:$0xff]  ;;  %v17_v6 = vld [vmem:[%s1897_s0 + $0x10] sm:$0xff] }
   0x2   :  { %v15_v1 = vld [vmem:[%s1897_s0] sm:$0xff]  ;;  %v34_v3 = vand.u32 4294901760, %v19_v0  ;;  %v25_v5 = vsel %vm20_vm0, %v16_v2, 0  ;;  %v18_v7 = vld [vmem:[%s1897_s0 + $0x18] sm:$0xff]  ;;  %v28_v10 = vsel %vm20_vm0, %v17_v6, 0 }
   0x3   :  { %v22_v4 = vsel %vm20_vm0, %v15_v1, 0  ;;  %v109_v9 = vand.u32 4294901760, %v25_v5  ;;  %v31_v11 = vsel %vm20_vm0, %v18_v7, 0 }
   0x4   :  { %v99_v8 = vand.u32 4294901760, %v22_v4 }
   0x5   :  { %8 = vsyncpa [#allocation3], 0  ;;  %1497 = vmatprep.subr.mxu0 %v34_v3  ;;  %v141_v12 = vsub.f32 %v19_v0, %v34_v3  ;;  %v119_v13 = vand.u32 4294901760, %v28_v10  ;;  %v129_v14 = vand.u32 4294901760, %v31_v11  ;;  %v110_v16 = vsub.f32 %v25_v5, %v109_v9  ;;  %s1778_s0 = smov 95  }
   0x6   :  { %1498 = vmatpush3.msra.mxu0 %v34_v3  ;;  %v100_v15 = vsub.f32 %v22_v4, %v99_v8  ;;  %v1777_v34 = vmov 32   ;;  %v672_v7 = vlaneseq  ;;  %vm700_vm3 = vcmask 261120  }
   0x7   :  { %v142_v17 = vand.u32 4294901760, %v141_v12  ;;  %v120_v18 = vsub.f32 %v28_v10, %v119_v13  ;;  %v130_v19 = vsub.f32 %v31_v11, %v129_v14  ;;  %v111_v21 = vand.u32 4294901760, %v110_v16  ;;  %1727 = vset.pattern.permute.xlu0 %v1777_v34  ;;  %1728 = vset.pattern.permute.xlu1 %v1777_v34 }
   0x8   :  { %v101_v20 = vand.u32 4294901760, %v100_v15 }
   0x9   :  { %v143_v22 = vsub.f32 %v141_v12, %v142_v17  ;;  %v121_v23 = vand.u32 4294901760, %v120_v18  ;;  %v131_v24 = vand.u32 4294901760, %v130_v19  ;;  %v112_v26 = vsub.f32 %v110_v16, %v111_v21 }
   0xa   :  { %v102_v25 = vsub.f32 %v100_v15, %v101_v20 }
   0xb   :  { %v144_v27 = vand.u32 4294901760, %v143_v22  ;;  %v122_v28 = vsub.f32 %v120_v18, %v121_v23  ;;  %v132_v29 = vsub.f32 %v130_v19, %v131_v24  ;;  %v113_v31 = vand.u32 4294901760, %v112_v26 }
   0xc   :  { %v103_v30 = vand.u32 4294901760, %v102_v25 }
   0xd   :  { %1505 = vmatprep.subr.mxu0 %v144_v27  ;;  %v123_v32 = vand.u32 4294901760, %v122_v28  ;;  %v133_v33 = vand.u32 4294901760, %v132_v29 }
   0xe   :  { %1499 = vmatprep.mubr.f32.mxu0 %v103_v30 }
   0xf   :  { %1500 = vmatmul.mubr.f32.vlgmr.msra.gmra.mrb[0].mxu0 %v113_v31  ;;  %v694_v31 = vld [vmem:[%s1898_s1 + $0x10] sm:$0xff] }
  0x10   :  { %1506 = vmatpush3.msra.mxu0 %v144_v27  ;;  %1502 = vmatprep.mubr.f32.mxu0 %v123_v32 }
  0x11   :  { %1513 = vmatprep.subr.mxu0 %v141_v12 }
  0x13   :  { %1503 = vmatmul.mubr.f32.gmra.mrb[2].mxu0 %v133_v33 }
  0x14   :  { %1507 = vmatprep.mubr.f32.mxu0 %v99_v8 }
  0x17   :  { %1508 = vmatmul.mubr.f32.vlgmr.msra.gmra.mrb[0].mxu0 %v109_v9 }
  0x18   :  { %1514 = vmatpush3.msra.mxu0 %v141_v12  ;;  %1510 = vmatprep.mubr.f32.mxu0 %v119_v13 }
  0x19   :  { %1521 = vmatprep.subr.mxu0 %v34_v3 }
  0x1b   :  { %1511 = vmatmul.mubr.f32.gmra.mrb[2].mxu0 %v129_v14 }
  0x1c   :  { %1515 = vmatprep.mubr.f32.mxu0 %v100_v15 }
  0x1f   :  { %1516 = vmatmul.mubr.f32.vlgmr.msra.gmra.mrb[0].mxu0 %v110_v16 }
  0x20   :  { %1522 = vmatpush3.msra.mxu0 %v34_v3  ;;  %1518 = vmatprep.mubr.f32.mxu0 %v120_v18  ;;  %v692_v18 = vld [vmem:[%s1898_s1] sm:$0xff] }
  0x21   :  { %1529 = vmatprep.subr.mxu0 %v142_v17 }
  0x23   :  { %1519 = vmatmul.mubr.f32.gmra.mrb[2].mxu0 %v130_v19 }
  0x24   :  { %1523 = vmatprep.mubr.f32.mxu0 %v101_v20 }
  0x27   :  { %1524 = vmatmul.mubr.f32.vlgmr.msra.gmra.mrb[0].mxu0 %v111_v21 }
  0x28   :  { %1530 = vmatpush3.msra.mxu0 %v142_v17  ;;  %1526 = vmatprep.mubr.f32.mxu0 %v121_v23 }
  0x29   :  { %1537 = vmatprep.subr.mxu0 %v34_v3 }
  0x2b   :  { %1527 = vmatmul.mubr.f32.gmra.mrb[2].mxu0 %v131_v24  ;;  %v693_v24 = vld [vmem:[%s1898_s1 + $0x8] sm:$0xff] }
  0x2c   :  { %1531 = vmatprep.mubr.f32.mxu0 %v99_v8 }
  0x2f   :  { %1532 = vmatmul.mubr.f32.vlgmr.msra.gmra.mrb[0].mxu0 %v109_v9 }
  0x30   :  { %1538 = vmatpush3.msra.mxu0 %v34_v3  ;;  %1534 = vmatprep.mubr.f32.mxu0 %v119_v13 }
  0x33   :  { %1535 = vmatmul.mubr.f32.gmra.mrb[2].mxu0 %v129_v14 }
  0x34   :  { %1539 = vmatprep.mubr.f32.mxu0 %v99_v8 }
  0x37   :  { %1540 = vmatmul.mubr.f32.vlgmr.msra.gmra.mrb[0].mxu0 %v109_v9  ;;  %v673_v9 = vshrl.u32 %v672_v7, 7 }
  0x38   :  { %1542 = vmatprep.mubr.f32.mxu0 %v119_v13 }
  0x39   :  { %v674_v11 = vsub.s32 0, %v673_v9 }
  0x3b   :  { %1543 = vmatmul.mubr.f32.gmra.mrb[2].mxu0 %v129_v14 }
 0x10a   :  { %v1541_v35 = vpop.f32.mrb[0].mxu0 }
 0x10b   :  { %v761_v36 = vand.u32 4294901760, %v1541_v35  ;;  %v586_v37 = vpop.f32.mrb[1].mxu0 }
 0x10c   :  { %v758_v38 = vand.u32 4294901760, %v586_v37  ;;  %612 = vrot.lane.b32.xlu0 %v586_v37, %s1778_s0 }
 0x10d   :  { %v875_v39 = vsub.f32 %v1541_v35, %v761_v36 }
 0x10e   :  { %v1817_v40 = vpack.c.bf16 %v761_v36, %v758_v38  ;;  %v868_v41 = vsub.f32 %v586_v37, %v758_v38  ;;  %v1544_v42 = vpop.f32.mrb[2].mxu0  ;;  %v695_v36 = vld [vmem:[%s1898_s1 + $0x18] sm:$0xff]  ;;  %s1779_s1 = smov [#allocation2]  }
 0x10f   :  { %v767_v43 = vand.u32 4294901760, %v1544_v42  ;;  %618 = vrot.lane.b32.xlu1 %v1544_v42, %s1778_s0  ;;  %v598_v44 = vpop.f32.mrb[3].mxu0  ;;  %v876_v45 = vand.u32 4294901760, %v875_v39  ;;  %s1404_s29 = sshll.u32 %s1779_s1, 4  ;;  %s1405_s29 = int_to_ptr.vmem [resolvable:$true] %s1404_s29 }
 0x110   :  { %v764_v46 = vand.u32 4294901760, %v598_v44  ;;  %614 = vrot.lane.b32.xlu0 %v1541_v35, %s1778_s0  ;;  %1630 = vmatprep.subr.bf16.mxu1 %v1817_v40  ;;  %v869_v47 = vand.u32 4294901760, %v868_v41  ;;  %v1820_v48 = vpack.c.bf16 %v875_v39, %v868_v41  ;;  %s1753_s30 = scalar_lea.vmem %s1405_s29, 512  ;;  %p1758_p1 = scmp.lt.s32.totalorder %s1405_s29, %s1405_s29 }
 0x111   :  { %v889_v49 = vsub.f32 %v1544_v42, %v767_v43  ;;  %1670 = vmatprep.subr.bf16.mxu0 %v1817_v40  ;;  %1632 = vmatpush3.bf16.msra.mxu1 %v1817_v40  ;;  %v877_v50 = vsub.f32 %v875_v39, %v876_v45  ;;  %p1754_p0 = scmp.ne.s32.totalorder %s1405_s29, %s1753_s30  ;;  %p1759_p2 = scmp.lt.s32.totalorder %s1753_s30, %s1753_s30 }
 0x112   :  { %v1824_v51 = vpack.c.bf16 %v767_v43, %v764_v46  ;;  %v882_v52 = vsub.f32 %v598_v44, %v764_v46  ;;  %1672 = vmatpush3.bf16.msra.mxu0 %v1817_v40  ;;  %v870_v53 = vsub.f32 %v868_v41, %v869_v47  ;;  %v1827_v54 = vpack.c.bf16 %v876_v45, %v869_v47 }
 0x113   :  { %616 = vrot.lane.b32.xlu1 %v598_v44, %s1778_s0  ;;  %v878_v55 = vand.u32 4294901760, %v877_v50  ;;  %v890_v56 = vand.u32 4294901760, %v889_v49  ;;  %p1760_p3 = por %p1759_p2, %p1758_p1 }
 0x114   :  { %657 = vperm.xlu0 %1727, %v586_v37   ;;  %1634 = vmatprep.subr.bf16.mxu1 %v1824_v51  ;;  %v871_v57 = vand.u32 4294901760, %v870_v53  ;;  %v883_v58 = vand.u32 4294901760, %v882_v52  ;;  %v1830_v59 = vpack.c.bf16 %v889_v49, %v882_v52 }
 0x115   :  { %1674 = vmatprep.subr.bf16.mxu0 %v1824_v51  ;;  %1636 = vmatpush3.bf16.msra.mxu1 %v1824_v51  ;;  %v891_v60 = vsub.f32 %v889_v49, %v890_v56  ;;  %p1761_p4 = pnand %p1760_p3, %p1754_p0 }
 0x116   :  { %1676 = vmatpush3.bf16.msra.mxu0 %v1824_v51  ;;  %v1835_v61 = vpack.c.bf16 %v878_v55, %v871_v57  ;;  %v884_v62 = vsub.f32 %v882_v52, %v883_v58  ;;  %v1837_v63 = vpack.c.bf16 %v890_v56, %v883_v58 }
 0x117   :  { %661 = vperm.xlu1 %1728, %v1541_v35   ;;  %v892_v0 = vand.u32 4294901760, %v891_v60 }
 0x118   :  { %669 = vperm.xlu0 %1727, %v1544_v42   ;;  %1638 = vmatprep.subr.bf16.mxu1 %v1835_v61  ;;  %v885_v1 = vand.u32 4294901760, %v884_v62 }
 0x11a   :  { %v1840_v2 = vpack.c.bf16 %v892_v0, %v885_v1 }
 0x11b   :  { %665 = vperm.xlu1 %1728, %v598_v44  }
 0x17e   :  { %v613_v3 = vpop.permute.xlu0 %612 }
 0x17f   :  { %624 = vxpose.xlu1.b32.start [1/4] (short) (narrow) %v613_v3, 8 }
 0x181   :  { %v619_v4 = vpop.permute.xlu1 %618 }
 0x182   :  { %v615_v5 = vpop.permute.xlu0 %614 }
 0x183   :  { %625 = vxpose.xlu1.b32.cont [2/4] (short) (narrow) %v615_v5, 8 }
 0x185   :  { %v617_v6 = vpop.permute.xlu1 %616 }
 0x187   :  { %626 = vxpose.xlu1.b32.cont [3/4] (short) (narrow) %v617_v6, 8 }
 0x18b   :  { %627 = vxpose.xlu1.b32.end [4/4] (short) (narrow) %v619_v4, 8 }
 0x193   :  { %v658_v12 = vpop.permute.xlu0 %657 }
 0x196   :  { %v662_v8 = vpop.permute.xlu1 %661 }
 0x197   :  { %v670_v21 = vpop.permute.xlu0 %669 }
 0x19a   :  { %v666_v10 = vpop.permute.xlu1 %665 }
 0x1ff   :  { %v640_v13 = vpop.trf.xlu1 }
 0x200   :  { %v675_v14 = vrot.slane %v640_v13, %v674_v11 }
 0x202   :  { %v676_v15 = vadd.f32 %v675_v14, %v658_v12  ;;  %v677_v16 = vadd.f32 %v675_v14, %v662_v8  ;;  %v678_v17 = vadd.f32 %v675_v14, %v666_v10  ;;  %v679_v26 = vadd.f32 %v675_v14, %v670_v21 }
 0x204   :  { %vm680_vm1 = vcmp.gt.f32.partialorder %v676_v15, 0.0  ;;  %v684_v19 = vmul.f32 0.2, %v676_v15  ;;  %vm681_vm2 = vcmp.gt.f32.partialorder %v677_v16, 0.0  ;;  %v685_v20 = vmul.f32 0.2, %v677_v16 }
 0x205   :  { %v686_v25 = vmul.f32 0.2, %v678_v17  ;;  %vm682_vm4 = vcmp.gt.f32.partialorder %v678_v17, 0.0  ;;  %v687_v32 = vmul.f32 0.2, %v679_v26  ;;  %vm683_vm5 = vcmp.gt.f32.partialorder %v679_v26, 0.0 }
 0x206   :  { %v688_v22 = vsel %vm680_vm1, %v676_v15, %v684_v19  ;;  %v689_v23 = vsel %vm681_vm2, %v677_v16, %v685_v20 }
 0x207   :  { %v696_v27 = vadd.f32 %v692_v18, %v688_v22  ;;  %v697_v29 = vadd.f32 %v693_v24, %v689_v23  ;;  %v690_v30 = vsel %vm682_vm4, %v678_v17, %v686_v25  ;;  %v691_v35 = vsel %vm683_vm5, %v679_v26, %v687_v32 }
 0x208   :  { %v698_v34 = vadd.f32 %v694_v31, %v690_v30  ;;  %v699_v38 = vadd.f32 %v695_v36, %v691_v35 }
 0x209   :  { %v701_v28 = vsel %vm700_vm3, %v696_v27, -inf  ;;  %v704_v33 = vsel %vm700_vm3, %v697_v29, -inf }
 0x20a   :  { %702 = vmax.xlane.f32.xlu0 %v701_v28  ;;  %v707_v37 = vsel %vm700_vm3, %v698_v34, -inf  ;;  %v710_v39 = vsel %vm700_vm3, %v699_v38, -inf }
 0x20e   :  { %705 = vmax.xlane.f32.xlu0 %v704_v33 }
 0x212   :  { %708 = vmax.xlane.f32.xlu0 %v707_v37 }
 0x216   :  { %711 = vmax.xlane.f32.xlu0 %v710_v39 }
 0x297   :  { %v703_v41 = vpop.xlane.xlu0 %702 }
 0x298   :  { %v713_v42 = vsub.f32 %v696_v27, %v703_v41 }
 0x29a   :  { %v717_v43 = vmul.f32 1.442695, %v713_v42 }
 0x29b   :  { %v706_v44 = vpop.xlane.xlu0 %705 }
 0x29c   :  { %1729 = vpow2.f32 %v717_v43  ;;  %v714_v45 = vsub.f32 %v697_v29, %v706_v44 }
 0x29e   :  { %v719_v46 = vmul.f32 1.442695, %v714_v45 }
 0x29f   :  { %v709_v47 = vpop.xlane.xlu0 %708 }
 0x2a0   :  { %1731 = vpow2.f32 %v719_v46  ;;  %v715_v49 = vsub.f32 %v698_v34, %v709_v47 }
 0x2a2   :  { %v721_v50 = vmul.f32 1.442695, %v715_v49 }
 0x2a3   :  { %v712_v52 = vpop.xlane.xlu0 %711 }
 0x2a4   :  { %1733 = vpow2.f32 %v721_v50  ;;  %v716_v53 = vsub.f32 %v699_v38, %v712_v52 }
 0x2a6   :  { %v1730_v55 = vpop.eup %1729  ;;  %v723_v56 = vmul.f32 1.442695, %v716_v53 }
 0x2a7   :  { %v725_v57 = vsel %vm700_vm3, %v1730_v55, 0.0 }
 0x2a8   :  { %1735 = vpow2.f32 %v723_v56  ;;  %726 = vadd.xlane.f32.xlu0 %v725_v57 }
 0x2aa   :  { %v1732_v58 = vpop.eup %1731 }
 0x2ab   :  { %v728_v60 = vsel %vm700_vm3, %v1732_v58, 0.0 }
 0x2ac   :  { %729 = vadd.xlane.f32.xlu0 %v728_v60 }
 0x2ae   :  { %v1734_v62 = vpop.eup %1733 }
 0x2af   :  { %v731_v0 = vsel %vm700_vm3, %v1734_v62, 0.0 }
 0x2b0   :  { %732 = vadd.xlane.f32.xlu1 %v731_v0 }
 0x2b2   :  { %v1736_v1 = vpop.eup %1735 }
 0x2b3   :  { %v734_v3 = vsel %vm700_vm3, %v1736_v1, 0.0 }
 0x2b4   :  { %735 = vadd.xlane.f32.xlu0 %v734_v3 }
 0x335   :  { %v727_v4 = vpop.xlane.xlu0 %726 }
 0x336   :  { %1737 = vrcp.f32 %v727_v4 }
 0x339   :  { %v730_v5 = vpop.xlane.xlu0 %729 }
 0x33a   :  { %1739 = vrcp.f32 %v730_v5 }
 0x33d   :  { %v733_v6 = vpop.xlane.xlu1 %732 }
 0x33e   :  { %1741 = vrcp.f32 %v733_v6 }
 0x340   :  { %v1738_v7 = vpop.eup %1737 }
 0x341   :  { %v736_v8 = vpop.xlane.xlu0 %735  ;;  %v738_v9 = vmul.f32 %v1738_v7, %v1730_v55 }
 0x342   :  { %1743 = vrcp.f32 %v736_v8 }
 0x343   :  { %v746_v10 = vsel %vm700_vm3, %v738_v9, 0 }
 0x344   :  { %v1740_v11 = vpop.eup %1739  ;;  %v826_v12 = vand.u32 4294901760, %v746_v10 }
 0x345   :  { %v740_v13 = vmul.f32 %v1740_v11, %v1732_v58 }
 0x346   :  { %1623 = vmatprep.mubr.f32.mxu0 %v826_v12  ;;  %v827_v14 = vsub.f32 %v746_v10, %v826_v12 }
 0x347   :  { %v749_v15 = vsel %vm700_vm3, %v740_v13, 0 }
 0x348   :  { %v1742_v16 = vpop.eup %1741  ;;  %v836_v17 = vand.u32 4294901760, %v749_v15  ;;  %v828_v18 = vand.u32 4294901760, %v827_v14 }
 0x349   :  { %v742_v19 = vmul.f32 %v1742_v16, %v1734_v62 }
 0x34a   :  { %1624 = vmatmul.mubr.f32.vlgmr.msra.gmra.mrb[4].mxu0 %v836_v17  ;;  %v829_v20 = vsub.f32 %v827_v14, %v828_v18  ;;  %v837_v21 = vsub.f32 %v749_v15, %v836_v17 }
 0x34b   :  { %v752_v22 = vsel %vm700_vm3, %v742_v19, 0 }
 0x34c   :  { %v1744_v23 = vpop.eup %1743  ;;  %v830_v24 = vand.u32 4294901760, %v829_v20  ;;  %v838_v25 = vand.u32 4294901760, %v837_v21  ;;  %v846_v26 = vand.u32 4294901760, %v752_v22 }
 0x34d   :  { %v744_v27 = vmul.f32 %v1744_v23, %v1736_v1 }
 0x34e   :  { %1553 = vmatprep.mubr.f32.mxu1 %v830_v24  ;;  %v839_v28 = vsub.f32 %v837_v21, %v838_v25  ;;  %v847_v29 = vsub.f32 %v752_v22, %v846_v26 }
 0x34f   :  { %v755_v30 = vsel %vm700_vm3, %v744_v27, 0 }
 0x350   :  { %v840_v31 = vand.u32 4294901760, %v839_v28  ;;  %v848_v32 = vand.u32 4294901760, %v847_v29  ;;  %v856_v33 = vand.u32 4294901760, %v755_v30 }
 0x352   :  { %1554 = vmatmul.mubr.f32.vlgmr.msra.gmra.mrb[0].mxu1 %v840_v31  ;;  %v849_v34 = vsub.f32 %v847_v29, %v848_v32  ;;  %v857_v35 = vsub.f32 %v755_v30, %v856_v33 }
 0x353   :  { %1640 = vmatpush3.bf16.msra.mxu1 %v1835_v61 }
 0x354   :  { %1642 = vmatprep.subr.bf16.mxu1 %v1840_v2  ;;  %v850_v36 = vand.u32 4294901760, %v849_v34  ;;  %v858_v37 = vand.u32 4294901760, %v857_v35 }
 0x356   :  { %1556 = vmatprep.mubr.f32.mxu1 %v850_v36  ;;  %v859_v38 = vsub.f32 %v857_v35, %v858_v37 }
 0x357   :  { %1644 = vmatpush3.bf16.msra.mxu1 %v1840_v2 }
 0x358   :  { %1646 = vmatprep.subr.bf16.mxu1 %v1820_v48  ;;  %v860_v39 = vand.u32 4294901760, %v859_v38 }
 0x35a   :  { %1557 = vmatmul.mubr.f32.gmra.mrb[2].mxu1 %v860_v39 }
 0x35b   :  { %1567 = vmatprep.mubr.f32.mxu1 %v826_v12 }
 0x35e   :  { %1568 = vmatmul.mubr.f32.vlgmr.msra.gmra.mrb[0].mxu1 %v836_v17 }
 0x35f   :  { %1648 = vmatpush3.bf16.msra.mxu1 %v1820_v48  ;;  %1570 = vmatprep.mubr.f32.mxu1 %v846_v26 }
 0x360   :  { %1650 = vmatprep.subr.bf16.mxu1 %v1830_v59 }
 0x362   :  { %1571 = vmatmul.mubr.f32.gmra.mrb[2].mxu1 %v856_v33 }
 0x363   :  { %1652 = vmatpush3.bf16.msra.mxu1 %v1830_v59  ;;  %1581 = vmatprep.mubr.f32.mxu1 %v827_v14 }
 0x364   :  { %1654 = vmatprep.subr.bf16.mxu1 %v1817_v40 }
 0x366   :  { %1582 = vmatmul.mubr.f32.vlgmr.msra.gmra.mrb[0].mxu1 %v837_v21 }
 0x367   :  { %1656 = vmatpush3.bf16.msra.mxu1 %v1817_v40  ;;  %1584 = vmatprep.mubr.f32.mxu1 %v847_v29 }
 0x368   :  { %1658 = vmatprep.subr.bf16.mxu1 %v1824_v51 }
 0x36a   :  { %1585 = vmatmul.mubr.f32.gmra.mrb[2].mxu1 %v857_v35 }
 0x36b   :  { %1660 = vmatpush3.bf16.msra.mxu1 %v1824_v51  ;;  %1595 = vmatprep.mubr.f32.mxu1 %v828_v18 }
 0x36c   :  { %1662 = vmatprep.subr.bf16.mxu1 %v1827_v54 }
 0x36e   :  { %1596 = vmatmul.mubr.f32.vlgmr.msra.gmra.mrb[0].mxu1 %v838_v25 }
 0x36f   :  { %1664 = vmatpush3.bf16.msra.mxu1 %v1827_v54  ;;  %1598 = vmatprep.mubr.f32.mxu1 %v848_v32 }
 0x370   :  { %1666 = vmatprep.subr.bf16.mxu1 %v1837_v63 }
 0x372   :  { %1599 = vmatmul.mubr.f32.gmra.mrb[2].mxu1 %v858_v37 }
 0x373   :  { %1668 = vmatpush3.bf16.msra.mxu1 %v1837_v63  ;;  %1609 = vmatprep.mubr.f32.mxu1 %v826_v12 }
 0x374   :  { %1677 = vmatprep.subr.bf16.mxu1 %v1817_v40 }
 0x376   :  { %1610 = vmatmul.mubr.f32.vlgmr.msra.gmra.mrb[0].mxu1 %v836_v17 }
 0x377   :  { %1679 = vmatpush3.bf16.msra.mxu1 %v1817_v40  ;;  %1612 = vmatprep.mubr.f32.mxu1 %v846_v26 }
 0x378   :  { %1678 = vmatprep.subr.bf16.mxu1 %v1824_v51 }
 0x37a   :  { %1613 = vmatmul.mubr.f32.gmra.mrb[2].mxu1 %v856_v33 }
 0x37b   :  { %1680 = vmatpush3.bf16.msra.mxu1 %v1824_v51  ;;  %1626 = vmatprep.mubr.f32.mxu1 %v846_v26 }
 0x382   :  { %1627 = vmatmul.mubr.f32.vlgmr.msra.gmra.mrb[2].mxu1 %v856_v33 }
 0x41d   :  { %v1625_v48 = vpop.f32.mrb[4].mxu0 }
 0x41e   :  { %v1349_v54 = vpop.f32.mrb[5].mxu0 }
 0x449   :  { %v1611_v59 = vpop.f32.mrb[0].mxu1 }
 0x44a   :  { %v1681_v61 = vadd.f32 %v1625_v48, %v1611_v59  ;;  %v1256_v2 = vpop.f32.mrb[1].mxu1 }
 0x44b   :  { %v1682_v63 = vadd.f32 %v1349_v54, %v1256_v2 }
 0x44c   :  { %v1376_v41 = vmin.f32 %v1681_v61, 0.0  ;;  %vm1372_vm6 = vcmp.gt.f32.partialorder %v1681_v61, 0.0 }
 0x44d   :  { %v1375_v42 = vmin.f32 %v1682_v63, 0.0  ;;  %vm1371_vm7 = vcmp.gt.f32.partialorder %v1682_v63, 0.0 }
 0x44e   :  { %v1381_v43 = vmul.f32 1.442695, %v1376_v41 }
 0x44f   :  { %v1379_v44 = vmul.f32 1.442695, %v1375_v42 }
 0x450   :  { %1745 = vpow2.f32 %v1381_v43 }
 0x451   :  { %1747 = vpow2.f32 %v1379_v44 }
 0x455   :  { %v1628_v40 = vpop.f32.mrb[2].mxu1 }
 0x456   :  { %v1378_v45 = vmin.f32 %v1628_v40, 0.0  ;;  %v1361_v46 = vpop.f32.mrb[3].mxu1  ;;  %vm1374_vm8 = vcmp.gt.f32.partialorder %v1628_v40, 0.0 }
 0x457   :  { %v1377_v47 = vmin.f32 %v1361_v46, 0.0  ;;  %vm1373_vm9 = vcmp.gt.f32.partialorder %v1361_v46, 0.0 }
 0x458   :  { %v1385_v49 = vmul.f32 1.442695, %v1378_v45 }
 0x459   :  { %v1383_v51 = vmul.f32 1.442695, %v1377_v47 }
 0x45a   :  { %v1746_v50 = vpop.eup %1745  ;;  %1749 = vpow2.f32 %v1385_v49 }
 0x45b   :  { %v1748_v52 = vpop.eup %1747  ;;  %v1416_v53 = vadd.f32 -1.0, %v1746_v50  ;;  %1751 = vpow2.f32 %v1383_v51 }
 0x45c   :  { %v1415_v55 = vadd.f32 -1.0, %v1748_v52 }
 0x45d   :  { %v1392_v56 = vsel %vm1372_vm6, %v1681_v61, %v1416_v53 }
 0x45e   :  { %1396 = vst [vmem:[#allocation2 + $0x8] sm:$0xff] %v1392_v56  ;;  %v1391_v57 = vsel %vm1371_vm7, %v1682_v63, %v1415_v55 }
 0x45f   :  { %1395 = vst [vmem:[#allocation2] sm:$0xff] %v1391_v57 }
 0x464   :  { %v1750_v58 = vpop.eup %1749 }
 0x465   :  { %v1752_v60 = vpop.eup %1751  ;;  %v1418_v62 = vadd.f32 -1.0, %v1750_v58 }
 0x466   :  { %v1417_v0 = vadd.f32 -1.0, %v1752_v60 }
 0x467   :  { %v1394_v1 = vsel %vm1374_vm8, %v1628_v40, %v1418_v62 }
 0x468   :  { %1398 = vst [vmem:[#allocation2 + $0x18] sm:$0xff] %v1394_v1  ;;  %v1393_v3 = vsel %vm1373_vm9, %v1361_v46, %v1417_v0 }
 0x469   :  { %1397 = vst [vmem:[#allocation2 + $0x10] sm:$0xff] %v1393_v3 }
 0x46a   :  { %1764 = shalt.err (!%p1761_p4)
}
 0x46b   :  { %s1765_s6 = scalar_lea.hbm %s1900_s3, 512 }
 0x46c   :  { %p1766_p5 = scmp.ne.s32.totalorder %s1900_s3, %s1765_s6  ;;  %p1769_p6 = scmp.lt.u32.totalorder %s1765_s6, %s1900_s3 }
 0x46e   :  { %p1771_p7 = pnand %p1769_p6, %p1766_p5 }
 0x470   :  { %1774 = shalt.err (!%p1771_p7)
}
 0x471   :  { %s1780_s11 = smov 128   ;;  %s1781_s12 = smov 8  }
 0x472   :  { %1410 = dma.vmem_to_hbm [thread:$0]  %s1405_s29, 512, %s1900_s3, [#allocation3], %s1780_s11, %s1780_s11, %s1781_s12  }
 0x473   :  { %1775 = dma.done.wait [#allocation3], 512  }
 0x474   :  { %1776 = vsyncadd [#allocation3], 4294966784 }
 0x475   :  { %1414 = vsyncpa [#allocation3], 1 }

</bundles_post_ra>
